<compile_context>
chip_gen: v7x
topology: tpu7x:2x2x1
jax: 0.10.0
libtpu: 0.0.40
codegen_flags: <defaults>
</compile_context>

<pallas_src>
from functools import partial

import jax
import jax.numpy as jnp
from jax.experimental import pallas as pl
from jax.experimental.pallas import tpu as pltpu  # noqa: F401  (kept for TPU-specific tuning)


# ----------------------------------------------------------------------------
# Helpers
# ----------------------------------------------------------------------------
def _round_up(n, m):
    return ((n + m - 1) // m) * m


# ----------------------------------------------------------------------------
# Fused Pallas kernel: whole autoencoder forward in one call
# ----------------------------------------------------------------------------
def _autoencoder_fused_kernel(*refs, activations):
    """refs = (x_ref, w0_ref, b0_ref, w1_ref, b1_ref, ..., o_ref).

    Each w is (K_pad, N_pad) already transposed to (in, out) host-side;
    each b is (1, N_pad). Activations are chained entirely in registers/VMEM.
    """
    n_layers = len(activations)
    x_ref = refs[0]
    o_ref = refs[1 + 2 * n_layers]

    h = x_ref[...].astype(jnp.float32)
    for i in range(n_layers):
        w = refs[1 + 2 * i][...]          # (K_pad, N_pad) -> MXU, no transpose
        b = refs[2 + 2 * i][...]          # (1, N_pad)
        y = jnp.dot(h, w, preferred_element_type=jnp.float32) + b
        act = activations[i]
        if act == "relu":
            y = jnp.maximum(y, 0.0)
        elif act == "sigmoid":
            # EUP-friendly sigmoid (tanh on the EUP slot, no VALU divide).
            y = 0.5 * (jnp.tanh(0.5 * y) + 1.0)
        h = y
    o_ref[...] = h.astype(o_ref.dtype)


# ----------------------------------------------------------------------------
# Host-side parameter prep: transpose + zero-pad to lane/sublane-friendly sizes
# ----------------------------------------------------------------------------
def prepare_fused_params(layers, lane=128):
    """layers: list of (W(out,in) PyTorch layout, b(out,), act).

    Returns list of (W_T_padded (K_pad, N_pad), b_padded (1, N_pad), act, out_f).
    """
    prepared = []
    for w, b, act in layers:
        out_f, in_f = w.shape
        k_pad = _round_up(in_f, lane)
        n_pad = _round_up(out_f, lane)
        wt = jnp.zeros((k_pad, n_pad), w.dtype).at[:in_f, :out_f].set(w.T)
        bp = jnp.zeros((1, n_pad), b.dtype).at[0, :out_f].set(b)
        prepared.append((wt, bp, act, out_f))
    return prepared


# ----------------------------------------------------------------------------
# Forward pass (single pallas_call)
# ----------------------------------------------------------------------------
def autoencoder_forward_pallas(x, prepared_layers):
    m, n_in = x.shape
    m_pad = _round_up(m, 8)                         # sublane multiple
    k0 = prepared_layers[0][0].shape[0]             # padded input width
    n_out_pad = prepared_layers[-1][0].shape[1]     # padded output width
    n_out = prepared_layers[-1][3]                  # logical output width

    x_pad = jnp.zeros((m_pad, k0), x.dtype).at[:m, :n_in].set(x)

    activations = tuple(act for _, _, act, _ in prepared_layers)

    flat_inputs = [x_pad]
    in_specs = [pl.BlockSpec(x_pad.shape, lambda: (0, 0))]
    for w, b, _, _ in prepared_layers:
        flat_inputs.append(w)
        flat_inputs.append(b)
        in_specs.append(pl.BlockSpec(w.shape, lambda: (0, 0)))
        in_specs.append(pl.BlockSpec(b.shape, lambda: (0, 0)))

    out_pad = pl.pallas_call(
        partial(_autoencoder_fused_kernel, activations=activations),
        out_shape=jax.ShapeDtypeStruct((m_pad, n_out_pad), x.dtype),
        in_specs=in_specs,
        out_specs=pl.BlockSpec((m_pad, n_out_pad), lambda: (0, 0)),
    )(*flat_inputs)

    return out_pad[:m, :n_out]


# ----------------------------------------------------------------------------
# Parameter construction (deterministic, mirrors AutoEncoder.__init__ shapes)
# ----------------------------------------------------------------------------
def _init_linear(key, in_f, out_f, dtype=jnp.float32):
    # PyTorch nn.Linear default: U(-1/sqrt(in_f), 1/sqrt(in_f)) for W and b.
    kw, kb = jax.random.split(key)
    bound = 1.0 / jnp.sqrt(jnp.asarray(in_f, dtype))
    w = jax.random.uniform(kw, (out_f, in_f), dtype, minval=-bound, maxval=bound)
    b = jax.random.uniform(kb, (out_f,), dtype, minval=-bound, maxval=bound)
    return w, b


def build_autoencoder_params(key, n_input, n_nodes):
    """Returns a flat list of (W, b, activation) matching the PyTorch module."""
    layers = []
    keys = jax.random.split(key, 2 * len(n_nodes) + 2)
    k = iter(keys)

    # Encoder: Linear(n_input, n_nodes[0]) + ReLU
    layers.append((*_init_linear(next(k), n_input, n_nodes[0]), "relu"))
    # Hidden encoder layers + ReLU
    for idx in range(len(n_nodes) - 2):
        layers.append((*_init_linear(next(k), n_nodes[idx], n_nodes[idx + 1]), "relu"))
    # Bottleneck: no activation
    layers.append((*_init_linear(next(k), n_nodes[-2], n_nodes[-1]), "none"))

    # Decoder: Linear(n_nodes[idx], n_nodes[idx-1]) + ReLU for idx = len-1 .. 1
    for idx in range(len(n_nodes) - 1, 0, -1):
        layers.append((*_init_linear(next(k), n_nodes[idx], n_nodes[idx - 1]), "relu"))
    # Final: Linear(n_nodes[0], n_input) + Sigmoid
    layers.append((*_init_linear(next(k), n_nodes[0], n_input), "sigmoid"))

    return layers


# ----------------------------------------------------------------------------
# Pure-JAX reference
# ----------------------------------------------------------------------------
def autoencoder_forward_ref(x, layers):
    h = x
    for w, b, act in layers:
        h = h @ w.T + b
        if act == "relu":
            h = jnp.maximum(h, 0.0)
        elif act == "sigmoid":
            h = jax.nn.sigmoid(h)
    return h


# ----------------------------------------------------------------------------
if __name__ == "__main__":
    n_input = 16
    n_nodes = [32, 16, 8]   # encoder: 16->32->16->8 ; decoder: 8->16->32->16
    batch = 8

    key = jax.random.PRNGKey(0)
    k_params, k_x = jax.random.split(key)

    layers = build_autoencoder_params(k_params, n_input, n_nodes)
    prepared = prepare_fused_params(layers)
    x = jax.random.uniform(k_x, (batch, n_input), jnp.float32)

    out = autoencoder_forward_pallas(x, prepared)
    out = jax.block_until_ready(out)

    ref = autoencoder_forward_ref(x, layers)
    assert out.shape == (batch, n_input)
    assert jnp.allclose(out, ref, atol=1e-5, rtol=1e-5), "Pallas output mismatch vs reference"

    print("KERNEL_OK")
</pallas_src>

<mosaic_0001>
module attributes {stable_mosaic.version = 11 : i64} {
  func.func @_autoencoder_fused_kernel(%arg0: memref<8x128xf32, #tpu.memory_space<vmem>>, %arg1: memref<128x128xf32, #tpu.memory_space<vmem>>, %arg2: memref<1x128xf32, #tpu.memory_space<vmem>>, %arg3: memref<128x128xf32, #tpu.memory_space<vmem>>, %arg4: memref<1x128xf32, #tpu.memory_space<vmem>>, %arg5: memref<128x128xf32, #tpu.memory_space<vmem>>, %arg6: memref<1x128xf32, #tpu.memory_space<vmem>>, %arg7: memref<128x128xf32, #tpu.memory_space<vmem>>, %arg8: memref<1x128xf32, #tpu.memory_space<vmem>>, %arg9: memref<128x128xf32, #tpu.memory_space<vmem>>, %arg10: memref<1x128xf32, #tpu.memory_space<vmem>>, %arg11: memref<128x128xf32, #tpu.memory_space<vmem>>, %arg12: memref<1x128xf32, #tpu.memory_space<vmem>>, %arg13: memref<8x128xf32, #tpu.memory_space<vmem>>) attributes {dimension_semantics = [], scalar_prefetch = 0 : i64, scratch_operands = 0 : i64, tpu.core_type = #tpu.core_type<tc>} {
    %c0 = arith.constant 0 : index
    %c0_0 = arith.constant 0 : index
    %0 = vector.load %arg0[%c0, %c0_0] : memref<8x128xf32, #tpu.memory_space<vmem>>, vector<8x128xf32>
    %c0_1 = arith.constant 0 : index
    %c0_2 = arith.constant 0 : index
    %1 = vector.load %arg1[%c0_1, %c0_2] : memref<128x128xf32, #tpu.memory_space<vmem>>, vector<128x128xf32>
    %c0_3 = arith.constant 0 : index
    %c0_4 = arith.constant 0 : index
    %2 = vector.load %arg2[%c0_3, %c0_4] : memref<1x128xf32, #tpu.memory_space<vmem>>, vector<1x128xf32>
    %cst = arith.constant dense<0.000000e+00> : vector<8x128xf32>
    %3 = tpu.matmul %0, %1, %cst {dimension_numbers = #tpu.dot_dimension_numbers<[1], [0], [0], [1], [0, 0, 1, 1], [], []>} : vector<8x128xf32>, vector<128x128xf32>, vector<8x128xf32> -> vector<8x128xf32>
    %4 = vector.broadcast %2 : vector<1x128xf32> to vector<8x128xf32>
    %5 = arith.addf %3, %4 : vector<8x128xf32>
    %cst_5 = arith.constant 0.000000e+00 : f32
    %6 = vector.broadcast %cst_5 : f32 to vector<8x128xf32>
    %7 = arith.maximumf %5, %6 : vector<8x128xf32>
    %c0_6 = arith.constant 0 : index
    %c0_7 = arith.constant 0 : index
    %8 = vector.load %arg3[%c0_6, %c0_7] : memref<128x128xf32, #tpu.memory_space<vmem>>, vector<128x128xf32>
    %c0_8 = arith.constant 0 : index
    %c0_9 = arith.constant 0 : index
    %9 = vector.load %arg4[%c0_8, %c0_9] : memref<1x128xf32, #tpu.memory_space<vmem>>, vector<1x128xf32>
    %cst_10 = arith.constant dense<0.000000e+00> : vector<8x128xf32>
    %10 = tpu.matmul %7, %8, %cst_10 {dimension_numbers = #tpu.dot_dimension_numbers<[1], [0], [0], [1], [0, 0, 1, 1], [], []>} : vector<8x128xf32>, vector<128x128xf32>, vector<8x128xf32> -> vector<8x128xf32>
    %11 = vector.broadcast %9 : vector<1x128xf32> to vector<8x128xf32>
    %12 = arith.addf %10, %11 : vector<8x128xf32>
    %cst_11 = arith.constant 0.000000e+00 : f32
    %13 = vector.broadcast %cst_11 : f32 to vector<8x128xf32>
    %14 = arith.maximumf %12, %13 : vector<8x128xf32>
    %c0_12 = arith.constant 0 : index
    %c0_13 = arith.constant 0 : index
    %15 = vector.load %arg5[%c0_12, %c0_13] : memref<128x128xf32, #tpu.memory_space<vmem>>, vector<128x128xf32>
    %c0_14 = arith.constant 0 : index
    %c0_15 = arith.constant 0 : index
    %16 = vector.load %arg6[%c0_14, %c0_15] : memref<1x128xf32, #tpu.memory_space<vmem>>, vector<1x128xf32>
    %cst_16 = arith.constant dense<0.000000e+00> : vector<8x128xf32>
    %17 = tpu.matmul %14, %15, %cst_16 {dimension_numbers = #tpu.dot_dimension_numbers<[1], [0], [0], [1], [0, 0, 1, 1], [], []>} : vector<8x128xf32>, vector<128x128xf32>, vector<8x128xf32> -> vector<8x128xf32>
    %18 = vector.broadcast %16 : vector<1x128xf32> to vector<8x128xf32>
    %19 = arith.addf %17, %18 : vector<8x128xf32>
    %c0_17 = arith.constant 0 : index
    %c0_18 = arith.constant 0 : index
    %20 = vector.load %arg7[%c0_17, %c0_18] : memref<128x128xf32, #tpu.memory_space<vmem>>, vector<128x128xf32>
    %c0_19 = arith.constant 0 : index
    %c0_20 = arith.constant 0 : index
    %21 = vector.load %arg8[%c0_19, %c0_20] : memref<1x128xf32, #tpu.memory_space<vmem>>, vector<1x128xf32>
    %cst_21 = arith.constant dense<0.000000e+00> : vector<8x128xf32>
    %22 = tpu.matmul %19, %20, %cst_21 {dimension_numbers = #tpu.dot_dimension_numbers<[1], [0], [0], [1], [0, 0, 1, 1], [], []>} : vector<8x128xf32>, vector<128x128xf32>, vector<8x128xf32> -> vector<8x128xf32>
    %23 = vector.broadcast %21 : vector<1x128xf32> to vector<8x128xf32>
    %24 = arith.addf %22, %23 : vector<8x128xf32>
    %cst_22 = arith.constant 0.000000e+00 : f32
    %25 = vector.broadcast %cst_22 : f32 to vector<8x128xf32>
    %26 = arith.maximumf %24, %25 : vector<8x128xf32>
    %c0_23 = arith.constant 0 : index
    %c0_24 = arith.constant 0 : index
    %27 = vector.load %arg9[%c0_23, %c0_24] : memref<128x128xf32, #tpu.memory_space<vmem>>, vector<128x128xf32>
    %c0_25 = arith.constant 0 : index
    %c0_26 = arith.constant 0 : index
    %28 = vector.load %arg10[%c0_25, %c0_26] : memref<1x128xf32, #tpu.memory_space<vmem>>, vector<1x128xf32>
    %cst_27 = arith.constant dense<0.000000e+00> : vector<8x128xf32>
    %29 = tpu.matmul %26, %27, %cst_27 {dimension_numbers = #tpu.dot_dimension_numbers<[1], [0], [0], [1], [0, 0, 1, 1], [], []>} : vector<8x128xf32>, vector<128x128xf32>, vector<8x128xf32> -> vector<8x128xf32>
    %30 = vector.broadcast %28 : vector<1x128xf32> to vector<8x128xf32>
    %31 = arith.addf %29, %30 : vector<8x128xf32>
    %cst_28 = arith.constant 0.000000e+00 : f32
    %32 = vector.broadcast %cst_28 : f32 to vector<8x128xf32>
    %33 = arith.maximumf %31, %32 : vector<8x128xf32>
    %c0_29 = arith.constant 0 : index
    %c0_30 = arith.constant 0 : index
    %34 = vector.load %arg11[%c0_29, %c0_30] : memref<128x128xf32, #tpu.memory_space<vmem>>, vector<128x128xf32>
    %c0_31 = arith.constant 0 : index
    %c0_32 = arith.constant 0 : index
    %35 = vector.load %arg12[%c0_31, %c0_32] : memref<1x128xf32, #tpu.memory_space<vmem>>, vector<1x128xf32>
    %cst_33 = arith.constant dense<0.000000e+00> : vector<8x128xf32>
    %36 = tpu.matmul %33, %34, %cst_33 {dimension_numbers = #tpu.dot_dimension_numbers<[1], [0], [0], [1], [0, 0, 1, 1], [], []>} : vector<8x128xf32>, vector<128x128xf32>, vector<8x128xf32> -> vector<8x128xf32>
    %37 = vector.broadcast %35 : vector<1x128xf32> to vector<8x128xf32>
    %38 = arith.addf %36, %37 : vector<8x128xf32>
    %cst_34 = arith.constant 5.000000e-01 : f32
    %39 = vector.broadcast %cst_34 : f32 to vector<8x128xf32>
    %40 = arith.mulf %39, %38 : vector<8x128xf32>
    %41 = math.tanh %40 : vector<8x128xf32>
    %cst_35 = arith.constant 1.000000e+00 : f32
    %42 = vector.broadcast %cst_35 : f32 to vector<8x128xf32>
    %43 = arith.addf %41, %42 : vector<8x128xf32>
    %cst_36 = arith.constant 5.000000e-01 : f32
    %44 = vector.broadcast %cst_36 : f32 to vector<8x128xf32>
    %45 = arith.mulf %44, %43 : vector<8x128xf32>
    %c0_37 = arith.constant 0 : index
    %c0_38 = arith.constant 0 : index
    %46 = vector.load %arg13[%c0_37, %c0_38] : memref<8x128xf32, #tpu.memory_space<vmem>>, vector<8x128xf32>
    tpu.vector_store %arg13[%c0_37, %c0_38], %45 {strides = array<i32>} : memref<8x128xf32, #tpu.memory_space<vmem>>, vector<8x128xf32>,
    return
  }
}

</mosaic_0001>

<bundles_post_ra>
// kernel: tpu_custom_call.1
= control target key start
LH: loop header
LB: loop body
LE: loop exit
PB: predicated region body
PF: predicated region fallthrough
CT: control target
= control target key end

     0   :  { %18 = vsyncpa [#allocation3], 0  ;;  %s1662_s0 = inlined_call_operand.hbm [shape: f32[8,128], index: 0, kind: input, shape index: {}]   ;;  %s1663_s1 = inlined_call_operand.hbm [shape: f32[128,128], index: 1, kind: input, shape index: {}]   ;;  %s1664_s2 = inlined_call_operand.vmem [shape: f32[1,128], index: 2, kind: input, shape index: {}]   ;;  %s1665_s3 = inlined_call_operand.hbm [shape: f32[128,128], index: 3, kind: input, shape index: {}]   ;;  %s1666_s4 = inlined_call_operand.vmem [shape: f32[1,128], index: 4, kind: input, shape index: {}]   ;;  %s1667_s5 = inlined_call_operand.hbm [shape: f32[128,128], index: 5, kind: input, shape index: {}]   ;;  %s1668_s6 = inlined_call_operand.vmem [shape: f32[1,128], index: 6, kind: input, shape index: {}]   ;;  %s1669_s7 = inlined_call_operand.hbm [shape: f32[128,128], index: 7, kind: input, shape index: {}]   ;;  %s1670_s8 = inlined_call_operand.vmem [shape: f32[1,128], index: 8, kind: input, shape index: {}]   ;;  %s1671_s9 = inlined_call_operand.hbm [shape: f32[128,128], index: 9, kind: input, shape index: {}]   ;;  %s1672_s10 = inlined_call_operand.vmem [shape: f32[1,128], index: 10, kind: input, shape index: {}]   ;;  %s1673_s11 = inlined_call_operand.hbm [shape: f32[128,128], index: 11, kind: input, shape index: {}]   ;;  %s1674_s12 = inlined_call_operand.vmem [shape: f32[1,128], index: 12, kind: input, shape index: {}]   ;;  %s1675_s13 = inlined_call_operand.hbm [shape: f32[8,128], index: 13, kind: output, shape index: {}]  }
   0x1   :  { %19 = vsyncpa [#allocation6], 0 }
   0x2   :  { %20 = vsyncpa [#allocation9], 0 }
   0x3   :  { %21 = vsyncpa [#allocation12], 0 }
   0x4   :  { %22 = vsyncpa [#allocation4], 0  ;;  %s1387_s25 = smov [#allocation5]   ;;  %s1201_s29 = scalar_lea.hbm %s1663_s1, 2048 }
   0x5   :  { %s38_s26 = sshll.u32 %s1387_s25, 4  ;;  %p1202_p0 = scmp.ne.s32.totalorder %s1663_s1, %s1201_s29  ;;  %s39_s26 = int_to_ptr.vmem [resolvable:$true] %s38_s26 }
   0x6   :  { %p1205_p1 = scmp.lt.u32.totalorder %s1201_s29, %s1663_s1 }
   0x8   :  { %p1207_p2 = pnand %p1205_p1, %p1202_p0 }
   0xa   :  { %1210 = shalt.err (!%p1207_p2)
}
   0xb   :  { %s1211_s17 = scalar_lea.vmem %s39_s26, 2048  ;;  %p1216_p4 = scmp.lt.s32.totalorder %s39_s26, %s39_s26 }
   0xc   :  { %p1212_p3 = scmp.ne.s32.totalorder %s39_s26, %s1211_s17  ;;  %p1217_p5 = scmp.lt.s32.totalorder %s1211_s17, %s1211_s17 }
   0xe   :  { %p1218_p6 = por %p1217_p5, %p1216_p4 }
  0x10   :  { %p1219_p7 = pnand %p1218_p6, %p1212_p3 }
  0x12   :  { %1222 = shalt.err (!%p1219_p7)
}
  0x13   :  { %s1388_s18 = smov 128   ;;  %s1389_s19 = smov 8  }
  0x14   :  { %44 = dma.hbm_to_vmem [thread:$0]  %s1663_s1, 2048, %s39_s26, [#allocation6], %s1388_s18, %s1388_s18, %s1389_s19  }
  0x15   :  { %s1390_s22 = smov [#allocation8]   ;;  %s1391_s24 = smov [#allocation11]  }
  0x16   :  { %s66_s23 = sshll.u32 %s1390_s22, 4  ;;  %s94_s25 = sshll.u32 %s1391_s24, 4  ;;  %s67_s23 = int_to_ptr.vmem [resolvable:$true] %s66_s23  ;;  %s95_s25 = int_to_ptr.vmem [resolvable:$true] %s94_s25 }
  0x17   :  { %s1223_s29 = scalar_lea.hbm %s1667_s5, 2048 }
  0x18   :  { %p1224_p8 = scmp.ne.s32.totalorder %s1667_s5, %s1223_s29  ;;  %p1227_p9 = scmp.lt.u32.totalorder %s1223_s29, %s1667_s5 }
  0x1a   :  { %p1229_p10 = pnand %p1227_p9, %p1224_p8 }
  0x1c   :  { %1232 = shalt.err (!%p1229_p10)
}
  0x1d   :  { %s1233_s1 = scalar_lea.vmem %s67_s23, 2048  ;;  %p1238_p12 = scmp.lt.s32.totalorder %s67_s23, %s67_s23 }
  0x1e   :  { %p1234_p11 = scmp.ne.s32.totalorder %s67_s23, %s1233_s1  ;;  %p1239_p13 = scmp.lt.s32.totalorder %s1233_s1, %s1233_s1 }
  0x20   :  { %p1240_p0 = por %p1239_p13, %p1238_p12 }
  0x22   :  { %p1241_p1 = pnand %p1240_p0, %p1234_p11 }
  0x24   :  { %1244 = shalt.err (!%p1241_p1)
}
  0x25   :  { %72 = dma.hbm_to_vmem [thread:$0]  %s1667_s5, 2048, %s67_s23, [#allocation9], %s1388_s18, %s1388_s18, %s1389_s19  }
  0x26   :  { %s1245_s22 = scalar_lea.hbm %s1671_s9, 2048 }
  0x27   :  { %p1246_p2 = scmp.ne.s32.totalorder %s1671_s9, %s1245_s22  ;;  %p1249_p3 = scmp.lt.u32.totalorder %s1245_s22, %s1671_s9 }
  0x29   :  { %p1251_p4 = pnand %p1249_p3, %p1246_p2 }
  0x2b   :  { %1254 = shalt.err (!%p1251_p4)
}
  0x2c   :  { %s1255_s30 = scalar_lea.vmem %s95_s25, 2048  ;;  %p1260_p6 = scmp.lt.s32.totalorder %s95_s25, %s95_s25 }
  0x2d   :  { %p1256_p5 = scmp.ne.s32.totalorder %s95_s25, %s1255_s30  ;;  %p1261_p7 = scmp.lt.s32.totalorder %s1255_s30, %s1255_s30 }
  0x2f   :  { %p1262_p8 = por %p1261_p7, %p1260_p6 }
  0x31   :  { %p1263_p9 = pnand %p1262_p8, %p1256_p5 }
  0x33   :  { %1266 = shalt.err (!%p1263_p9)
}
  0x34   :  { %100 = dma.hbm_to_vmem [thread:$0]  %s1671_s9, 2048, %s95_s25, [#allocation12], %s1388_s18, %s1388_s18, %s1389_s19  }
  0x35   :  { %s1392_s14 = smov [#allocation2]   ;;  %s1393_s16 = smov [#allocation7]  }
  0x36   :  { %s29_s15 = sshll.u32 %s1392_s14, 4  ;;  %s52_s1 = sshll.u32 %s1393_s16, 4  ;;  %s30_s15 = int_to_ptr.vmem [resolvable:$true] %s29_s15  ;;  %s53_s1 = int_to_ptr.vmem [resolvable:$true] %s52_s1 }
  0x37   :  { %s1267_s20 = scalar_lea.hbm %s1662_s0, 128 }
  0x38   :  { %p1268_p10 = scmp.ne.s32.totalorder %s1662_s0, %s1267_s20  ;;  %p1271_p11 = scmp.lt.u32.totalorder %s1267_s20, %s1662_s0 }
  0x3a   :  { %p1273_p12 = pnand %p1271_p11, %p1268_p10 }
  0x3c   :  { %1276 = shalt.err (!%p1273_p12)
}
  0x3d   :  { %s1277_s9 = scalar_lea.vmem %s30_s15, 128  ;;  %p1282_p0 = scmp.lt.s32.totalorder %s30_s15, %s30_s15 }
  0x3e   :  { %p1278_p13 = scmp.ne.s32.totalorder %s30_s15, %s1277_s9  ;;  %p1283_p1 = scmp.lt.s32.totalorder %s1277_s9, %s1277_s9 }
  0x40   :  { %p1284_p2 = por %p1283_p1, %p1282_p0 }
  0x42   :  { %p1285_p3 = pnand %p1284_p2, %p1278_p13 }
  0x44   :  { %1288 = shalt.err (!%p1285_p3)
}
  0x45   :  { %32 = dma.hbm_to_vmem [thread:$0]  %s1662_s0, 128, %s30_s15, [#allocation3]  }
  0x46   :  { %s1289_s5 = scalar_lea.hbm %s1665_s3, 2048 }
  0x47   :  { %p1290_p4 = scmp.ne.s32.totalorder %s1665_s3, %s1289_s5  ;;  %p1293_p5 = scmp.lt.u32.totalorder %s1289_s5, %s1665_s3 }
  0x49   :  { %p1295_p6 = pnand %p1293_p5, %p1290_p4 }
  0x4b   :  { %1298 = shalt.err (!%p1295_p6)
}
  0x4c   :  { %s1299_s17 = scalar_lea.vmem %s53_s1, 2048  ;;  %p1304_p8 = scmp.lt.s32.totalorder %s53_s1, %s53_s1 }
  0x4d   :  { %p1300_p7 = scmp.ne.s32.totalorder %s53_s1, %s1299_s17  ;;  %p1305_p9 = scmp.lt.s32.totalorder %s1299_s17, %s1299_s17 }
  0x4f   :  { %p1306_p10 = por %p1305_p9, %p1304_p8 }
  0x51   :  { %p1307_p11 = pnand %p1306_p10, %p1300_p7 }
  0x53   :  { %1310 = shalt.err (!%p1307_p11)
}
  0x54   :  { %58 = dma.hbm_to_vmem [thread:$0]  %s1665_s3, 2048, %s53_s1, [#allocation6], %s1388_s18, %s1388_s18, %s1389_s19  }
  0x55   :  { %s1394_s20 = smov [#allocation10]   ;;  %s1395_s22 = smov [#allocation13]  }
  0x56   :  { %s80_s21 = sshll.u32 %s1394_s20, 4  ;;  %s108_s24 = sshll.u32 %s1395_s22, 4  ;;  %s81_s21 = int_to_ptr.vmem [resolvable:$true] %s80_s21  ;;  %s109_s24 = int_to_ptr.vmem [resolvable:$true] %s108_s24 }
  0x57   :  { %s1311_s25 = scalar_lea.hbm %s1669_s7, 2048 }
  0x58   :  { %p1312_p12 = scmp.ne.s32.totalorder %s1669_s7, %s1311_s25  ;;  %p1315_p13 = scmp.lt.u32.totalorder %s1311_s25, %s1669_s7 }
  0x5a   :  { %p1317_p0 = pnand %p1315_p13, %p1312_p12 }
  0x5c   :  { %1320 = shalt.err (!%p1317_p0)
}
  0x5d   :  { %s1321_s3 = scalar_lea.vmem %s81_s21, 2048  ;;  %p1326_p2 = scmp.lt.s32.totalorder %s81_s21, %s81_s21 }
  0x5e   :  { %p1322_p1 = scmp.ne.s32.totalorder %s81_s21, %s1321_s3  ;;  %p1327_p3 = scmp.lt.s32.totalorder %s1321_s3, %s1321_s3 }
  0x60   :  { %p1328_p4 = por %p1327_p3, %p1326_p2 }
  0x62   :  { %p1329_p5 = pnand %p1328_p4, %p1322_p1 }
  0x64   :  { %1332 = shalt.err (!%p1329_p5)
}
  0x65   :  { %86 = dma.hbm_to_vmem [thread:$0]  %s1669_s7, 2048, %s81_s21, [#allocation9], %s1388_s18, %s1388_s18, %s1389_s19  }
  0x66   :  { %s1333_s26 = scalar_lea.hbm %s1673_s11, 2048 }
  0x67   :  { %p1334_p6 = scmp.ne.s32.totalorder %s1673_s11, %s1333_s26  ;;  %p1337_p7 = scmp.lt.u32.totalorder %s1333_s26, %s1673_s11 }
  0x69   :  { %p1339_p8 = pnand %p1337_p7, %p1334_p6 }
  0x6b   :  { %1342 = shalt.err (!%p1339_p8)
}
  0x6c   :  { %s1343_s22 = scalar_lea.vmem %s109_s24, 2048  ;;  %p1348_p10 = scmp.lt.s32.totalorder %s109_s24, %s109_s24 }
  0x6d   :  { %p1344_p9 = scmp.ne.s32.totalorder %s109_s24, %s1343_s22  ;;  %p1349_p11 = scmp.lt.s32.totalorder %s1343_s22, %s1343_s22 }
  0x6f   :  { %p1350_p12 = por %p1349_p11, %p1348_p10 }
  0x71   :  { %p1351_p13 = pnand %p1350_p12, %p1344_p9 }
  0x73   :  { %1354 = shalt.err (!%p1351_p13)
}
  0x74   :  { %114 = dma.hbm_to_vmem [thread:$0]  %s1673_s11, 2048, %s109_s24, [#allocation12], %s1388_s18, %s1388_s18, %s1389_s19  }
  0x75   :  { %1377 = dma.done.wait [#allocation3], 128  }
  0x76   :  { %1378 = vsyncadd [#allocation3], 4294967168 }
  0x77   :  { %1379 = dma.done.wait [#allocation6], 4096  }
  0x78   :  { %1380 = vsyncadd [#allocation6], 4294963200 }
  0x79   :  { %1381 = dma.done.wait [#allocation9], 4096  }
  0x7a   :  { %1382 = vsyncadd [#allocation9], 4294963200 }
  0x7b   :  { %1383 = dma.done.wait [#allocation12], 4096  }
  0x7c   :  { %1384 = vsyncadd [#allocation12], 4294963200  ;;  %v1396_v0 = vmov 0.0|0.0   ;;  %vm1397_vm0 = vmmov 0   ;;  %v1398_v1 = vmov 0.0   ;;  %v139_v2 = vld [vmem:[#allocation5] sm:$0xff] }
  0x7d   :  { %1042 = vmatprep.subr.bf16.mxu0 %v1396_v0  ;;  %864 = vmatprep.mubr.msk.f32.mxu0 %vm1397_vm0, %v1398_v1  ;;  %v140_v3 = vld [vmem:[#allocation5 + $0x8] sm:$0xff]  ;;  %v141_v4 = vld [vmem:[#allocation5 + $0x10] sm:$0xff]  ;;  %v142_v6 = vld [vmem:[#allocation5 + $0x18] sm:$0xff]  ;;  %s1399_s29 = smov [#allocation14]  }
  0x7e   :  { %1066 = vmatprep.subr.bf16.mxu1 %v1396_v0  ;;  %899 = vmatprep.mubr.msk.f32.mxu1 %vm1397_vm0, %v1398_v1  ;;  %v1043_v5 = vpack.c.bf16 %v140_v3, %v139_v2  ;;  %v1046_v7 = vpack.c.bf16 %v142_v6, %v141_v4  ;;  %v143_v8 = vld [vmem:[#allocation5 + $0x20] sm:$0xff]  ;;  %v144_v9 = vld [vmem:[#allocation5 + $0x28] sm:$0xff]  ;;  %v235_v12 = vld [vmem:[#allocation7 + $0x10] sm:$0xff]  ;;  %s712_s30 = sshll.u32 %s1399_s29, 4  ;;  %s713_s30 = int_to_ptr.vmem [resolvable:$true] %s712_s30 }
  0x7f   :  { %v233_v10 = vld [vmem:[#allocation7] sm:$0xff]  ;;  %v234_v11 = vld [vmem:[#allocation7 + $0x8] sm:$0xff]  ;;  %v236_v13 = vld [vmem:[#allocation7 + $0x18] sm:$0xff]  ;;  %v1049_v14 = vpack.c.bf16 %v144_v9, %v143_v8  ;;  %p1360_p1 = scmp.lt.s32.totalorder %s713_s30, %s713_s30 }
  0x80   :  { %1044 = vmatpush3.bf16.msra.mxu0 %v1043_v5  ;;  %v1067_v15 = vpack.c.bf16 %v234_v11, %v233_v10  ;;  %v145_v16 = vld [vmem:[#allocation5 + $0x30] sm:$0xff]  ;;  %v146_v17 = vld [vmem:[#allocation5 + $0x38] sm:$0xff]  ;;  %v1070_v18 = vpack.c.bf16 %v236_v13, %v235_v12  ;;  %v237_v19 = vld [vmem:[#allocation7 + $0x20] sm:$0xff] }
  0x81   :  { %1045 = vmatprep.subr.bf16.mxu0 %v1396_v0  ;;  %v238_v20 = vld [vmem:[#allocation7 + $0x28] sm:$0xff]  ;;  %v1052_v21 = vpack.c.bf16 %v146_v17, %v145_v16  ;;  %v147_v22 = vld [vmem:[#allocation5 + $0x40] sm:$0xff]  ;;  %v239_v25 = vld [vmem:[#allocation7 + $0x30] sm:$0xff] }
  0x82   :  { %1068 = vmatpush3.bf16.msra.mxu1 %v1067_v15  ;;  %v148_v23 = vld [vmem:[#allocation5 + $0x48] sm:$0xff]  ;;  %v1073_v24 = vpack.c.bf16 %v238_v20, %v237_v19  ;;  %v240_v26 = vld [vmem:[#allocation7 + $0x38] sm:$0xff]  ;;  %v149_v28 = vld [vmem:[#allocation5 + $0x50] sm:$0xff] }
  0x83   :  { %1069 = vmatprep.subr.bf16.mxu1 %v1396_v0  ;;  %v1055_v27 = vpack.c.bf16 %v148_v23, %v147_v22  ;;  %v150_v29 = vld [vmem:[#allocation5 + $0x58] sm:$0xff]  ;;  %v1076_v30 = vpack.c.bf16 %v240_v26, %v239_v25  ;;  %v241_v31 = vld [vmem:[#allocation7 + $0x40] sm:$0xff]  ;;  %v242_v32 = vld [vmem:[#allocation7 + $0x48] sm:$0xff] }
  0x84   :  { %1047 = vmatpush3.bf16.msra.mxu0 %v1046_v7  ;;  %v1058_v33 = vpack.c.bf16 %v150_v29, %v149_v28  ;;  %v151_v34 = vld [vmem:[#allocation5 + $0x60] sm:$0xff]  ;;  %v152_v35 = vld [vmem:[#allocation5 + $0x68] sm:$0xff]  ;;  %v1079_v36 = vpack.c.bf16 %v242_v32, %v241_v31  ;;  %v243_v37 = vld [vmem:[#allocation7 + $0x50] sm:$0xff] }
  0x85   :  { %1048 = vmatprep.subr.bf16.mxu0 %v1396_v0  ;;  %v244_v38 = vld [vmem:[#allocation7 + $0x58] sm:$0xff]  ;;  %v1061_v39 = vpack.c.bf16 %v152_v35, %v151_v34  ;;  %v153_v40 = vld [vmem:[#allocation5 + $0x70] sm:$0xff]  ;;  %v245_v43 = vld [vmem:[#allocation7 + $0x60] sm:$0xff] }
  0x86   :  { %1071 = vmatpush3.bf16.msra.mxu1 %v1070_v18  ;;  %v154_v41 = vld [vmem:[#allocation5 + $0x78] sm:$0xff]  ;;  %v1082_v42 = vpack.c.bf16 %v244_v38, %v243_v37  ;;  %v246_v44 = vld [vmem:[#allocation7 + $0x68] sm:$0xff]  ;;  %v247_v48 = vld [vmem:[#allocation7 + $0x70] sm:$0xff] }
  0x87   :  { %1072 = vmatprep.subr.bf16.mxu1 %v1396_v0  ;;  %v1064_v45 = vpack.c.bf16 %v154_v41, %v153_v40  ;;  %v1085_v46 = vpack.c.bf16 %v246_v44, %v245_v43  ;;  %v138_v47 = vld [vmem:[#allocation2] sm:$0xff]  ;;  %v327_v51 = vld [vmem:[#allocation8] sm:$0xff]  ;;  %v328_v52 = vld [vmem:[#allocation8 + $0x8] sm:$0xff] }
  0x88   :  { %1050 = vmatpush3.bf16.msra.mxu0 %v1049_v14  ;;  %v248_v49 = vld [vmem:[#allocation7 + $0x78] sm:$0xff]  ;;  %v329_v53 = vld [vmem:[#allocation8 + $0x10] sm:$0xff]  ;;  %v1091_v54 = vpack.c.bf16 %v328_v52, %v327_v51  ;;  %v331_v57 = vld [vmem:[#allocation8 + $0x20] sm:$0xff] }
  0x89   :  { %1051 = vmatprep.subr.bf16.mxu0 %v1396_v0  ;;  %v1088_v50 = vpack.c.bf16 %v248_v49, %v247_v48  ;;  %v330_v55 = vld [vmem:[#allocation8 + $0x18] sm:$0xff]  ;;  %v332_v58 = vld [vmem:[#allocation8 + $0x28] sm:$0xff]  ;;  %v333_v60 = vld [vmem:[#allocation8 + $0x30] sm:$0xff] }
  0x8a   :  { %1074 = vmatpush3.bf16.msra.mxu1 %v1073_v24  ;;  %v1094_v56 = vpack.c.bf16 %v330_v55, %v329_v53  ;;  %v1097_v59 = vpack.c.bf16 %v332_v58, %v331_v57  ;;  %v334_v61 = vld [vmem:[#allocation8 + $0x38] sm:$0xff]  ;;  %v335_v63 = vld [vmem:[#allocation8 + $0x40] sm:$0xff]  ;;  %v336_v2 = vld [vmem:[#allocation8 + $0x48] sm:$0xff] }
  0x8b   :  { %1075 = vmatprep.subr.bf16.mxu1 %v1396_v0  ;;  %v1100_v62 = vpack.c.bf16 %v334_v61, %v333_v60  ;;  %v1103_v3 = vpack.c.bf16 %v336_v2, %v335_v63  ;;  %v337_v4 = vld [vmem:[#allocation8 + $0x50] sm:$0xff]  ;;  %v338_v5 = vld [vmem:[#allocation8 + $0x58] sm:$0xff]  ;;  %v339_v7 = vld [vmem:[#allocation8 + $0x60] sm:$0xff] }
  0x8c   :  { %1053 = vmatpush3.bf16.msra.mxu0 %v1052_v21  ;;  %v1106_v6 = vpack.c.bf16 %v338_v5, %v337_v4  ;;  %v340_v8 = vld [vmem:[#allocation8 + $0x68] sm:$0xff]  ;;  %v724_v10 = vld [vmem:[%s1664_s2] ss:$0 sm:$0xff]  ;;  %v341_v15 = vld [vmem:[#allocation8 + $0x70] sm:$0xff] }
  0x8d   :  { %1054 = vmatprep.subr.bf16.mxu0 %v1396_v0  ;;  %v1109_v9 = vpack.c.bf16 %v340_v8, %v339_v7  ;;  %v342_v16 = vld [vmem:[#allocation8 + $0x78] sm:$0xff]  ;;  %v420_v18 = vld [vmem:[#allocation10] sm:$0xff]  ;;  %v421_v19 = vld [vmem:[#allocation10 + $0x8] sm:$0xff] }
  0x8e   :  { %1077 = vmatpush3.bf16.msra.mxu1 %v1076_v30  ;;  %v1112_v17 = vpack.c.bf16 %v342_v16, %v341_v15  ;;  %v422_v20 = vld [vmem:[#allocation10 + $0x10] sm:$0xff]  ;;  %v1115_v21 = vpack.c.bf16 %v421_v19, %v420_v18  ;;  %v423_v22 = vld [vmem:[#allocation10 + $0x18] sm:$0xff]  ;;  %v424_v24 = vld [vmem:[#allocation10 + $0x20] sm:$0xff] }
  0x8f   :  { %1078 = vmatprep.subr.bf16.mxu1 %v1396_v0  ;;  %v1118_v23 = vpack.c.bf16 %v423_v22, %v422_v20  ;;  %v425_v25 = vld [vmem:[#allocation10 + $0x28] sm:$0xff]  ;;  %v427_v28 = vld [vmem:[#allocation10 + $0x38] sm:$0xff]  ;;  %v428_v30 = vld [vmem:[#allocation10 + $0x40] sm:$0xff] }
  0x90   :  { %1056 = vmatpush3.bf16.msra.mxu0 %v1055_v27  ;;  %v1121_v26 = vpack.c.bf16 %v425_v25, %v424_v24  ;;  %v426_v27 = vld [vmem:[#allocation10 + $0x30] sm:$0xff]  ;;  %v429_v31 = vld [vmem:[#allocation10 + $0x48] sm:$0xff]  ;;  %v431_v34 = vld [vmem:[#allocation10 + $0x58] sm:$0xff] }
  0x91   :  { %1057 = vmatprep.subr.bf16.mxu0 %v1396_v0  ;;  %v1124_v29 = vpack.c.bf16 %v427_v28, %v426_v27  ;;  %v1127_v32 = vpack.c.bf16 %v429_v31, %v428_v30  ;;  %v433_v37 = vld [vmem:[#allocation10 + $0x68] sm:$0xff]  ;;  %v434_v44 = vld [vmem:[#allocation10 + $0x70] sm:$0xff]  ;;  %v517_v51 = vld [vmem:[#allocation11 + $0x18] sm:$0xff] }
  0x92   :  { %1080 = vmatpush3.bf16.msra.mxu1 %v1079_v36  ;;  %v432_v36 = vld [vmem:[#allocation10 + $0x60] sm:$0xff]  ;;  %v515_v48 = vld [vmem:[#allocation11 + $0x8] sm:$0xff]  ;;  %v516_v49 = vld [vmem:[#allocation11 + $0x10] sm:$0xff] }
  0x93   :  { %1081 = vmatprep.subr.bf16.mxu1 %v1396_v0  ;;  %v1133_v38 = vpack.c.bf16 %v433_v37, %v432_v36  ;;  %v1142_v52 = vpack.c.bf16 %v517_v51, %v516_v49  ;;  %v518_v53 = vld [vmem:[#allocation11 + $0x20] sm:$0xff]  ;;  %v521_v57 = vld [vmem:[#allocation11 + $0x38] sm:$0xff]  ;;  %v523_v60 = vld [vmem:[#allocation11 + $0x48] sm:$0xff] }
  0x94   :  { %1059 = vmatpush3.bf16.msra.mxu0 %v1058_v33  ;;  %v430_v33 = vld [vmem:[#allocation10 + $0x50] sm:$0xff]  ;;  %v525_v63 = vld [vmem:[#allocation11 + $0x58] sm:$0xff]  ;;  %v527_v4 = vld [vmem:[#allocation11 + $0x68] sm:$0xff] }
  0x95   :  { %1060 = vmatprep.subr.bf16.mxu0 %v1396_v0  ;;  %v1130_v35 = vpack.c.bf16 %v431_v34, %v430_v33  ;;  %v610_v15 = vld [vmem:[#allocation13 + $0x10] sm:$0xff]  ;;  %v612_v19 = vld [vmem:[#allocation13 + $0x20] sm:$0xff]  ;;  %v613_v20 = vld [vmem:[#allocation13 + $0x28] sm:$0xff] }
  0x96   :  { %1083 = vmatpush3.bf16.msra.mxu1 %v1082_v42  ;;  %v615_v22 = vld [vmem:[#allocation13 + $0x38] sm:$0xff]  ;;  %v616_v24 = vld [vmem:[#allocation13 + $0x40] sm:$0xff]  ;;  %v617_v25 = vld [vmem:[#allocation13 + $0x48] sm:$0xff] }
  0x97   :  { %1084 = vmatprep.subr.bf16.mxu1 %v1396_v0  ;;  %v618_v27 = vld [vmem:[#allocation13 + $0x50] sm:$0xff]  ;;  %v619_v28 = vld [vmem:[#allocation13 + $0x58] sm:$0xff]  ;;  %v620_v30 = vld [vmem:[#allocation13 + $0x60] sm:$0xff] }
  0x98   :  { %1062 = vmatpush3.bf16.msra.mxu0 %v1061_v39  ;;  %v725_v39 = vld [vmem:[%s1666_s4] ss:$0 sm:$0xff]  ;;  %v621_v31 = vld [vmem:[#allocation13 + $0x68] sm:$0xff] }
  0x99   :  { %1063 = vmatprep.subr.bf16.mxu0 %v1396_v0  ;;  %v727_v33 = vld [vmem:[%s1670_s8] ss:$0 sm:$0xff] }
  0x9a   :  { %1086 = vmatpush3.bf16.msra.mxu1 %v1085_v46 }
  0x9b   :  { %1087 = vmatprep.subr.bf16.mxu1 %v1396_v0 }
  0x9c   :  { %1065 = vmatpush3.bf16.msra.mxu0 %v1064_v45  ;;  %v435_v45 = vld [vmem:[#allocation10 + $0x78] sm:$0xff] }
  0x9d   :  { %1090 = vmatprep.subr.bf16.mxu0 %v1396_v0  ;;  %v1136_v46 = vpack.c.bf16 %v435_v45, %v434_v44  ;;  %v729_v45 = vld [vmem:[%s1674_s12] ss:$0 sm:$0xff] }
  0x9e   :  { %1089 = vmatpush3.bf16.msra.mxu1 %v1088_v50 }
  0x9f   :  { %865 = vmatmul.mubr.f32.vlgmr.msra.gmra.mrb[0].mxu0 %v138_v47  ;;  %1114 = vmatprep.subr.bf16.mxu1 %v1396_v0  ;;  %v514_v47 = vld [vmem:[#allocation11] sm:$0xff] }
  0xa0   :  { %934 = vmatprep.mubr.msk.f32.mxu0 %vm1397_vm0, %v1398_v1  ;;  %1092 = vmatpush3.bf16.msra.mxu0 %v1091_v54  ;;  %v1139_v50 = vpack.c.bf16 %v515_v48, %v514_v47  ;;  %v519_v54 = vld [vmem:[#allocation11 + $0x28] sm:$0xff] }
  0xa1   :  { %1093 = vmatprep.subr.bf16.mxu0 %v1396_v0  ;;  %v1145_v55 = vpack.c.bf16 %v519_v54, %v518_v53 }
  0xa4   :  { %1095 = vmatpush3.bf16.msra.mxu0 %v1094_v56  ;;  %v520_v56 = vld [vmem:[#allocation11 + $0x30] sm:$0xff] }
  0xa5   :  { %1096 = vmatprep.subr.bf16.mxu0 %v1396_v0  ;;  %v1148_v58 = vpack.c.bf16 %v521_v57, %v520_v56 }
  0xa8   :  { %1098 = vmatpush3.bf16.msra.mxu0 %v1097_v59  ;;  %v522_v59 = vld [vmem:[#allocation11 + $0x40] sm:$0xff] }
  0xa9   :  { %1099 = vmatprep.subr.bf16.mxu0 %v1396_v0  ;;  %v1151_v61 = vpack.c.bf16 %v523_v60, %v522_v59 }
  0xac   :  { %1101 = vmatpush3.bf16.msra.mxu0 %v1100_v62  ;;  %v524_v62 = vld [vmem:[#allocation11 + $0x50] sm:$0xff] }
  0xad   :  { %1102 = vmatprep.subr.bf16.mxu0 %v1396_v0  ;;  %v1154_v2 = vpack.c.bf16 %v525_v63, %v524_v62 }
  0xb0   :  { %1104 = vmatpush3.bf16.msra.mxu0 %v1103_v3  ;;  %v526_v3 = vld [vmem:[#allocation11 + $0x60] sm:$0xff] }
  0xb1   :  { %1105 = vmatprep.subr.bf16.mxu0 %v1396_v0  ;;  %v1157_v5 = vpack.c.bf16 %v527_v4, %v526_v3 }
  0xb4   :  { %1107 = vmatpush3.bf16.msra.mxu0 %v1106_v6  ;;  %v726_v6 = vld [vmem:[%s1668_s6] ss:$0 sm:$0xff] }
  0xb5   :  { %1108 = vmatprep.subr.bf16.mxu0 %v1396_v0 }
  0xb8   :  { %1110 = vmatpush3.bf16.msra.mxu0 %v1109_v9 }
  0xb9   :  { %1111 = vmatprep.subr.bf16.mxu0 %v1396_v0 }
  0xbc   :  { %1113 = vmatpush3.bf16.msra.mxu0 %v1112_v17  ;;  %v611_v17 = vld [vmem:[#allocation13 + $0x18] sm:$0xff] }
  0xbd   :  { %1138 = vmatprep.subr.bf16.mxu0 %v1396_v0  ;;  %v1166_v18 = vpack.c.bf16 %v611_v17, %v610_v15 }
 0x172   :  { %v228_v11 = vpop.f32.mrb[0].mxu0 }
 0x173   :  { %v229_v12 = vadd.f32 %v724_v10, %v228_v11  ;;  %v866_v13 = vpop.f32.mrb[1].mxu0  ;;  %v528_v10 = vld [vmem:[#allocation11 + $0x70] sm:$0xff]  ;;  %v529_v11 = vld [vmem:[#allocation11 + $0x78] sm:$0xff] }
 0x174   :  { %v608_v13 = vld [vmem:[#allocation13] sm:$0xff] }
 0x175   :  { %v232_v14 = vmax.f32 %v229_v12, 0.0  ;;  %v1160_v12 = vpack.c.bf16 %v529_v11, %v528_v10 }
 0x177   :  { %900 = vmatmul.mubr.f32.vlgmr.msra.gmra.mrb[0].mxu1 %v232_v14  ;;  %v609_v14 = vld [vmem:[#allocation13 + $0x8] sm:$0xff] }
 0x178   :  { %969 = vmatprep.mubr.msk.f32.mxu1 %vm1397_vm0, %v1398_v1  ;;  %1116 = vmatpush3.bf16.msra.mxu1 %v1115_v21  ;;  %v1163_v16 = vpack.c.bf16 %v609_v14, %v608_v13  ;;  %v1169_v21 = vpack.c.bf16 %v613_v20, %v612_v19 }
 0x179   :  { %1117 = vmatprep.subr.bf16.mxu1 %v1396_v0 }
 0x17c   :  { %1119 = vmatpush3.bf16.msra.mxu1 %v1118_v23 }
 0x17d   :  { %1120 = vmatprep.subr.bf16.mxu1 %v1396_v0 }
 0x180   :  { %1122 = vmatpush3.bf16.msra.mxu1 %v1121_v26  ;;  %v1175_v26 = vpack.c.bf16 %v617_v25, %v616_v24 }
 0x181   :  { %1123 = vmatprep.subr.bf16.mxu1 %v1396_v0 }
 0x184   :  { %1125 = vmatpush3.bf16.msra.mxu1 %v1124_v29  ;;  %v1178_v29 = vpack.c.bf16 %v619_v28, %v618_v27 }
 0x185   :  { %1126 = vmatprep.subr.bf16.mxu1 %v1396_v0 }
 0x188   :  { %1128 = vmatpush3.bf16.msra.mxu1 %v1127_v32  ;;  %v1181_v32 = vpack.c.bf16 %v621_v31, %v620_v30 }
 0x189   :  { %1129 = vmatprep.subr.bf16.mxu1 %v1396_v0 }
 0x18c   :  { %1131 = vmatpush3.bf16.msra.mxu1 %v1130_v35 }
 0x18d   :  { %1132 = vmatprep.subr.bf16.mxu1 %v1396_v0 }
 0x190   :  { %1134 = vmatpush3.bf16.msra.mxu1 %v1133_v38  ;;  %v622_v38 = vld [vmem:[#allocation13 + $0x70] sm:$0xff] }
 0x191   :  { %1135 = vmatprep.subr.bf16.mxu1 %v1396_v0 }
 0x194   :  { %1137 = vmatpush3.bf16.msra.mxu1 %v1136_v46 }
 0x195   :  { %1162 = vmatprep.subr.bf16.mxu1 %v1396_v0 }
 0x24a   :  { %v322_v40 = vpop.f32.mrb[0].mxu1 }
 0x24b   :  { %v323_v41 = vadd.f32 %v725_v39, %v322_v40  ;;  %v901_v42 = vpop.f32.mrb[1].mxu1  ;;  %v623_v39 = vld [vmem:[#allocation13 + $0x78] sm:$0xff] }
 0x24c   :  { %v1184_v40 = vpack.c.bf16 %v623_v39, %v622_v38 }
 0x24d   :  { %v326_v43 = vmax.f32 %v323_v41, 0.0  ;;  %v728_v41 = vld [vmem:[%s1672_s10] ss:$0 sm:$0xff]  ;;  %s1355_s10 = scalar_lea.vmem %s713_s30, 128 }
 0x24e   :  { %p1356_p0 = scmp.ne.s32.totalorder %s713_s30, %s1355_s10  ;;  %p1361_p2 = scmp.lt.s32.totalorder %s1355_s10, %s1355_s10 }
 0x24f   :  { %935 = vmatmul.mubr.f32.vlgmr.msra.gmra.mrb[2].mxu0 %v326_v43 }
 0x250   :  { %1004 = vmatprep.mubr.msk.f32.mxu0 %vm1397_vm0, %v1398_v1  ;;  %1140 = vmatpush3.bf16.msra.mxu0 %v1139_v50  ;;  %p1362_p3 = por %p1361_p2, %p1360_p1 }
 0x251   :  { %1141 = vmatprep.subr.bf16.mxu0 %v1396_v0 }
 0x252   :  { %p1363_p4 = pnand %p1362_p3, %p1356_p0 }
 0x254   :  { %1143 = vmatpush3.bf16.msra.mxu0 %v1142_v52 }
 0x255   :  { %1144 = vmatprep.subr.bf16.mxu0 %v1396_v0 }
 0x258   :  { %1146 = vmatpush3.bf16.msra.mxu0 %v1145_v55 }
 0x259   :  { %1147 = vmatprep.subr.bf16.mxu0 %v1396_v0 }
 0x25c   :  { %1149 = vmatpush3.bf16.msra.mxu0 %v1148_v58 }
 0x25d   :  { %1150 = vmatprep.subr.bf16.mxu0 %v1396_v0 }
 0x260   :  { %1152 = vmatpush3.bf16.msra.mxu0 %v1151_v61 }
 0x261   :  { %1153 = vmatprep.subr.bf16.mxu0 %v1396_v0 }
 0x264   :  { %1155 = vmatpush3.bf16.msra.mxu0 %v1154_v2 }
 0x265   :  { %1156 = vmatprep.subr.bf16.mxu0 %v1396_v0 }
 0x268   :  { %1158 = vmatpush3.bf16.msra.mxu0 %v1157_v5 }
 0x269   :  { %1159 = vmatprep.subr.bf16.mxu0 %v1396_v0 }
 0x26c   :  { %1161 = vmatpush3.bf16.msra.mxu0 %v1160_v12 }
 0x322   :  { %v416_v7 = vpop.f32.mrb[2].mxu0 }
 0x323   :  { %v417_v8 = vadd.f32 %v726_v6, %v416_v7  ;;  %v936_v9 = vpop.f32.mrb[3].mxu0 }
 0x325   :  { %970 = vmatmul.mubr.f32.vlgmr.msra.gmra.mrb[2].mxu1 %v417_v8 }
 0x326   :  { %1039 = vmatprep.mubr.msk.f32.mxu1 %vm1397_vm0, %v1398_v1  ;;  %1164 = vmatpush3.bf16.msra.mxu1 %v1163_v16  ;;  %v614_v1 = vld [vmem:[#allocation13 + $0x30] sm:$0xff] }
 0x327   :  { %1165 = vmatprep.subr.bf16.mxu1 %v1396_v0  ;;  %v1172_v23 = vpack.c.bf16 %v615_v22, %v614_v1 }
 0x32a   :  { %1167 = vmatpush3.bf16.msra.mxu1 %v1166_v18 }
 0x32b   :  { %1168 = vmatprep.subr.bf16.mxu1 %v1396_v0 }
 0x32e   :  { %1170 = vmatpush3.bf16.msra.mxu1 %v1169_v21 }
 0x32f   :  { %1171 = vmatprep.subr.bf16.mxu1 %v1396_v0 }
 0x332   :  { %1173 = vmatpush3.bf16.msra.mxu1 %v1172_v23 }
 0x333   :  { %1174 = vmatprep.subr.bf16.mxu1 %v1396_v0 }
 0x336   :  { %1176 = vmatpush3.bf16.msra.mxu1 %v1175_v26 }
 0x337   :  { %1177 = vmatprep.subr.bf16.mxu1 %v1396_v0 }
 0x33a   :  { %1179 = vmatpush3.bf16.msra.mxu1 %v1178_v29 }
 0x33b   :  { %1180 = vmatprep.subr.bf16.mxu1 %v1396_v0 }
 0x33e   :  { %1182 = vmatpush3.bf16.msra.mxu1 %v1181_v32 }
 0x33f   :  { %1183 = vmatprep.subr.bf16.mxu1 %v1396_v0 }
 0x342   :  { %1185 = vmatpush3.bf16.msra.mxu1 %v1184_v40 }
 0x3f8   :  { %v509_v34 = vpop.f32.mrb[2].mxu1 }
 0x3f9   :  { %v510_v35 = vadd.f32 %v727_v33, %v509_v34  ;;  %v971_v36 = vpop.f32.mrb[3].mxu1 }
 0x3fb   :  { %v513_v37 = vmax.f32 %v510_v35, 0.0 }
 0x3fd   :  { %1005 = vmatmul.mubr.f32.vlgmr.msra.gmra.mrb[4].mxu0 %v513_v37 }
 0x4d0   :  { %v603_v42 = vpop.f32.mrb[4].mxu0 }
 0x4d1   :  { %v604_v43 = vadd.f32 %v728_v41, %v603_v42  ;;  %v1006_v0 = vpop.f32.mrb[5].mxu0 }
 0x4d3   :  { %v607_v44 = vmax.f32 %v604_v43, 0.0 }
 0x4d5   :  { %1040 = vmatmul.mubr.f32.vlgmr.msra.gmra.mrb[4].mxu1 %v607_v44 }
 0x5a8   :  { %v697_v46 = vpop.f32.mrb[4].mxu1 }
 0x5a9   :  { %v698_v47 = vadd.f32 %v729_v45, %v697_v46  ;;  %v1041_v48 = vpop.f32.mrb[5].mxu1 }
 0x5ab   :  { %v701_v49 = vmul.f32 0.5, %v698_v47 }
 0x5ad   :  { %1199 = vtanh.f32 %v701_v49 }
 0x5b7   :  { %v1200_v50 = vpop.eup %1199 }
 0x5b8   :  { %v703_v51 = vadd.f32 1.0, %v1200_v50 }
 0x5ba   :  { %v704_v52 = vmul.f32 0.5, %v703_v51 }
 0x5bc   :  { %705 = vst [vmem:[#allocation14] sm:$0xff] %v704_v52 }
 0x5bd   :  { %1366 = shalt.err (!%p1363_p4)
}
 0x5be   :  { %s1367_s3 = scalar_lea.hbm %s1675_s13, 128 }
 0x5bf   :  { %p1368_p5 = scmp.ne.s32.totalorder %s1675_s13, %s1367_s3  ;;  %p1371_p6 = scmp.lt.u32.totalorder %s1367_s3, %s1675_s13 }
 0x5c1   :  { %p1373_p7 = pnand %p1371_p6, %p1368_p5 }
 0x5c3   :  { %1376 = shalt.err (!%p1373_p7)
}
 0x5c4   :  { %715 = dma.vmem_to_hbm [thread:$0]  %s713_s30, 128, %s1675_s13, [#allocation4]  }
 0x5c5   :  { %1385 = dma.done.wait [#allocation4], 128  }
 0x5c6   :  { %1386 = vsyncadd [#allocation4], 4294967168 }
 0x5c7   :  { %719 = vsyncpa [#allocation3], 1 }
 0x5c8   :  { %720 = vsyncpa [#allocation6], 1 }
 0x5c9   :  { %721 = vsyncpa [#allocation9], 1 }
 0x5ca   :  { %722 = vsyncpa [#allocation12], 1 }
 0x5cb   :  { %723 = vsyncpa [#allocation4], 1 }

</bundles_post_ra>
